<compile_context>
chip_gen: v7x
topology: tpu7x:2x2x1
jax: 0.10.0
libtpu: 0.0.40
codegen_flags: <defaults>
</compile_context>

<pallas_src>
import jax
import jax.numpy as jnp
from jax import lax
from jax.experimental import pallas as pl
from jax.experimental.pallas import tpu as pltpu


# ----------------------------------------------------------------------------
# small helpers
# ----------------------------------------------------------------------------

def _cdiv(a, b):
    return -(-a // b)


def _round_up(x, m):
    return _cdiv(x, m) * m


def _pick_tile(dim, max_tile, align):
    """Choose (tile, padded_dim): tile % align == 0, padded_dim % tile == 0,
    tile <= max(max_tile, align), minimizing zero padding."""
    d = _round_up(dim, align)
    if d <= max_tile:
        return d, d
    best_t, best_p = None, None
    n_lo = _cdiv(d, max_tile)
    n_hi = min(_cdiv(d, align), n_lo + 64)
    for n in range(n_lo, n_hi + 1):
        t = _round_up(_cdiv(d, n), align)
        p = t * n
        if best_p is None or p < best_p:
            best_t, best_p = t, p
        if p == d:
            break
    return best_t, best_p


# Conservative scoped-VMEM budget: fits v7x's 64 MiB physical VMEM with double buffering.
_VMEM_LIMIT_BYTES = 32 * 1024 * 1024

# Tile caps (bf16 operands): 2*(tm*tk + tk*tn)*2B + 2*(tm*tn)*4B (+residual) + acc ≈ a few MiB.
_TM_MAX = 512
_TK_MAX = 512
_TN_MAX = 256


# ----------------------------------------------------------------------------
# Pallas kernels
# ----------------------------------------------------------------------------

def _make_matmul_bn_kernel(apply_relu: bool, has_residual: bool):
    """Tiled fused kernel: out = maybe_relu(patches @ W * scale + bias (+ residual)).

    patches/W tiles are bf16; accumulation is f32 in a VMEM scratch; the BN/residual/ReLU
    epilogue runs only on the last K step.
    """

    def _epilogue(acc_ref, s_ref, b_ref, r_ref, o_ref):
        y = acc_ref[...] * s_ref[...] + b_ref[...]
        if has_residual:
            y = y + r_ref[...]
        if apply_relu:
            y = jnp.maximum(y, 0.0)
        o_ref[...] = y.astype(o_ref.dtype)

    if has_residual:
        def kernel(p_ref, w_ref, s_ref, b_ref, r_ref, o_ref, acc_ref):
            @pl.when(pl.program_id(2) == 0)
            def _():
                acc_ref[...] = jnp.zeros_like(acc_ref)

            acc_ref[...] += jnp.dot(p_ref[...], w_ref[...],
                                    preferred_element_type=jnp.float32)

            @pl.when(pl.program_id(2) == pl.num_programs(2) - 1)
            def _():
                _epilogue(acc_ref, s_ref, b_ref, r_ref, o_ref)
    else:
        def kernel(p_ref, w_ref, s_ref, b_ref, o_ref, acc_ref):
            @pl.when(pl.program_id(2) == 0)
            def _():
                acc_ref[...] = jnp.zeros_like(acc_ref)

            acc_ref[...] += jnp.dot(p_ref[...], w_ref[...],
                                    preferred_element_type=jnp.float32)

            @pl.when(pl.program_id(2) == pl.num_programs(2) - 1)
            def _():
                _epilogue(acc_ref, s_ref, b_ref, None, o_ref)

    return kernel


def fused_matmul_bn(patches, w_mat, scale, bias, residual=None, relu=True):
    """patches: (M, K) bf16   w_mat: (K, Cout) bf16   scale/bias: (Cout,) f32
    residual: (M, Cout) f32 or None.  Returns (M, Cout) f32."""
    M, K = patches.shape
    Cout = w_mat.shape[1]

    tm, Mp = _pick_tile(M, _TM_MAX, 16)      # 16-row sublane groups (bf16 packing)
    tk, Kp = _pick_tile(K, _TK_MAX, 128)
    tn, Cp = _pick_tile(Cout, _TN_MAX, 128)

    p = jnp.pad(patches.astype(jnp.bfloat16), ((0, Mp - M), (0, Kp - K)))
    w = jnp.pad(w_mat.astype(jnp.bfloat16), ((0, Kp - K), (0, Cp - Cout)))
    s = jnp.pad(scale.astype(jnp.float32), (0, Cp - Cout)).reshape(1, Cp)
    b = jnp.pad(bias.astype(jnp.float32), (0, Cp - Cout)).reshape(1, Cp)

    args = [p, w, s, b]
    in_specs = [
        pl.BlockSpec((tm, tk), lambda i, j, k: (i, k)),
        pl.BlockSpec((tk, tn), lambda i, j, k: (k, j)),
        # k-invariant index maps: scale/bias stay resident across the reduction axis.
        pl.BlockSpec((1, tn), lambda i, j, k: (0, j)),
        pl.BlockSpec((1, tn), lambda i, j, k: (0, j)),
    ]
    if residual is not None:
        r = jnp.pad(residual.astype(jnp.float32), ((0, Mp - M), (0, Cp - Cout)))
        args.append(r)
        in_specs.append(pl.BlockSpec((tm, tn), lambda i, j, k: (i, j)))

    grid = (Mp // tm, Cp // tn, Kp // tk)
    kernel = _make_matmul_bn_kernel(apply_relu=relu, has_residual=residual is not None)

    out = pl.pallas_call(
        kernel,
        out_shape=jax.ShapeDtypeStruct((Mp, Cp), jnp.float32),
        grid_spec=pltpu.PrefetchScalarGridSpec(
            num_scalar_prefetch=0,
            grid=grid,
            in_specs=in_specs,
            out_specs=pl.BlockSpec((tm, tn), lambda i, j, k: (i, j)),
            scratch_shapes=[pltpu.VMEM((tm, tn), jnp.float32)],
        ),
        compiler_params=pltpu.CompilerParams(
            dimension_semantics=("parallel", "parallel", "arbitrary"),
            vmem_limit_bytes=_VMEM_LIMIT_BYTES,
        ),
    )(*args)

    if Mp != M or Cp != Cout:
        out = out[:M, :Cout]
    return out


def _maxpool_quad_kernel(ee_ref, eo_ref, oe_ref, oo_ref, o_ref):
    """3x3/s2/p1 max-pool from 4 stride-2 quadrants of the (-inf)-padded input.

    ee/eo/oe/oo blocks: (1, Ho+1, Wo+1, C);  output block: (1, Ho, Wo, C).
    window(ho,wo) = padded rows {2ho,2ho+1,2ho+2} x cols {2wo,2wo+1,2wo+2}
                  = 4 ee taps + 2 eo taps + 2 oe taps + 1 oo tap (unit-stride shifts).
    """
    _, Ho, Wo, _ = o_ref.shape
    ee = ee_ref[0]
    eo = eo_ref[0]
    oe = oe_ref[0]
    oo = oo_ref[0]

    m = ee[:Ho, :Wo, :]
    m = jnp.maximum(m, ee[:Ho, 1:Wo + 1, :])
    m = jnp.maximum(m, ee[1:Ho + 1, :Wo, :])
    m = jnp.maximum(m, ee[1:Ho + 1, 1:Wo + 1, :])
    m = jnp.maximum(m, eo[:Ho, :Wo, :])
    m = jnp.maximum(m, eo[1:Ho + 1, :Wo, :])
    m = jnp.maximum(m, oe[:Ho, :Wo, :])
    m = jnp.maximum(m, oe[:Ho, 1:Wo + 1, :])
    m = jnp.maximum(m, oo[:Ho, :Wo, :])
    o_ref[0] = m


def max_pool_3x3_s2_p1(x):
    """nn.MaxPool2d(kernel_size=3, stride=2, padding=1) on NHWC f32 input."""
    N, H, W, C = x.shape
    Ho = (H + 2 - 3) // 2 + 1
    Wo = (W + 2 - 3) // 2 + 1
    xp = jnp.pad(x, ((0, 0), (1, 1), (1, 1), (0, 0)), constant_values=-jnp.inf)

    # Stride-2 "quadrant" split (total bytes == input bytes; no 9x tap expansion).
    ee = xp[:, 0::2, 0::2, :]
    eo = xp[:, 0::2, 1::2, :]
    oe = xp[:, 1::2, 0::2, :]
    oo = xp[:, 1::2, 1::2, :]

    Hq, Wq = Ho + 1, Wo + 1

    def _fit(q):
        q = q[:, :Hq, :Wq, :]
        ph, pw = Hq - q.shape[1], Wq - q.shape[2]
        if ph or pw:
            q = jnp.pad(q, ((0, 0), (0, ph), (0, pw), (0, 0)),
                        constant_values=-jnp.inf)
        return q

    ee, eo, oe, oo = _fit(ee), _fit(eo), _fit(oe), _fit(oo)

    quad_spec = pl.BlockSpec((1, Hq, Wq, C), lambda n: (n, 0, 0, 0))
    out = pl.pallas_call(
        _maxpool_quad_kernel,
        out_shape=jax.ShapeDtypeStruct((N, Ho, Wo, C), jnp.float32),
        grid=(N,),
        in_specs=[quad_spec, quad_spec, quad_spec, quad_spec],
        out_specs=pl.BlockSpec((1, Ho, Wo, C), lambda n: (n, 0, 0, 0)),
        compiler_params=pltpu.CompilerParams(
            dimension_semantics=("parallel",),
            vmem_limit_bytes=_VMEM_LIMIT_BYTES,
        ),
    )(ee, eo, oe, oo)
    return out


# ----------------------------------------------------------------------------
# Glue: im2col, conv+bn wrapper (NHWC)
# ----------------------------------------------------------------------------

def _im2col(x, kh, kw, stride, pad):
    """x: (N, H, W, C) -> patches (N*Ho*Wo, kh*kw*C), Ho, Wo.  Kept in x.dtype (bf16)."""
    N, H, W, C = x.shape
    Ho = (H + 2 * pad - kh) // stride + 1
    Wo = (W + 2 * pad - kw) // stride + 1
    xp = jnp.pad(x, ((0, 0), (pad, pad), (pad, pad), (0, 0)))
    taps = []
    for di in range(kh):
        for dj in range(kw):
            taps.append(
                lax.slice(
                    xp,
                    (0, di, dj, 0),
                    (N, di + stride * (Ho - 1) + 1, dj + stride * (Wo - 1) + 1, C),
                    (1, stride, stride, 1),
                )
            )
    patches = jnp.stack(taps, axis=3)               # (N, Ho, Wo, kh*kw, C)
    return patches.reshape(N * Ho * Wo, kh * kw * C), Ho, Wo


def conv_bn(x, w, scale, bias, stride, pad, relu=True, residual=None):
    """x: (N,H,W,Cin) NHWC f32; w: (kh,kw,Cin,Cout) f32; returns NHWC f32."""
    N = x.shape[0]
    kh, kw, cin, cout = w.shape
    # bf16 matmul operands (f32 accumulation in-kernel) halve im2col HBM traffic.
    patches, Ho, Wo = _im2col(x.astype(jnp.bfloat16), kh, kw, stride, pad)
    res_flat = None
    if residual is not None:
        res_flat = residual.reshape(N * Ho * Wo, cout)
    out = fused_matmul_bn(patches,
                          w.reshape(kh * kw * cin, cout).astype(jnp.bfloat16),
                          scale, bias, residual=res_flat, relu=relu)
    return out.reshape(N, Ho, Wo, cout)


# ----------------------------------------------------------------------------
# ResNet18 structure (PretrainedEncoder('resnet18', pretrained=True, blocks=4))
# ----------------------------------------------------------------------------

LAYER_CFG = [(64, 2, 1), (128, 2, 2), (256, 2, 2), (512, 2, 2)]  # (cout, n_blocks, first_stride)


def _conv_w(key, kh, kw, cin, cout):
    fan_in = kh * kw * cin
    return (jax.random.normal(key, (kh, kw, cin, cout), jnp.float32)
            * (2.0 / fan_in) ** 0.5)


def _bn_folded(key, c, eps=1e-5):
    k1, k2, k3, k4 = jax.random.split(key, 4)
    gamma = 1.0 + 0.1 * jax.random.normal(k1, (c,), jnp.float32)
    beta = 0.1 * jax.random.normal(k2, (c,), jnp.float32)
    run_mean = 0.1 * jax.random.normal(k3, (c,), jnp.float32)
    run_var = 0.5 + jax.random.uniform(k4, (c,), jnp.float32)
    scale = gamma / jnp.sqrt(run_var + eps)       # eval-mode BN folded to affine
    bias = beta - run_mean * scale
    return scale, bias


def init_resnet18_encoder_params(seed=0, in_ch=3, blocks=4):
    keys = iter(jax.random.split(jax.random.PRNGKey(seed), 128))
    params = {}
    params["conv1_w"] = _conv_w(next(keys), 7, 7, in_ch, 64)
    params["bn1_s"], params["bn1_b"] = _bn_folded(next(keys), 64)
    cin = 64
    layers = []
    for cout, nblk, first_stride in LAYER_CFG[:blocks]:
        blocks_p = []
        for bi in range(nblk):
            s = first_stride if bi == 0 else 1
            bp = {"stride": s}
            bp["conv1_w"] = _conv_w(next(keys), 3, 3, cin, cout)
            bp["bn1_s"], bp["bn1_b"] = _bn_folded(next(keys), cout)
            bp["conv2_w"] = _conv_w(next(keys), 3, 3, cout, cout)
            bp["bn2_s"], bp["bn2_b"] = _bn_folded(next(keys), cout)
            if s != 1 or cin != cout:
                bp["down_w"] = _conv_w(next(keys), 1, 1, cin, cout)
                bp["dbn_s"], bp["dbn_b"] = _bn_folded(next(keys), cout)
            blocks_p.append(bp)
            cin = cout
        layers.append(blocks_p)
    params["layers"] = layers
    return params


def basic_block(x, bp):
    """torchvision BasicBlock: relu(bn2(conv2(relu(bn1(conv1(x))))) + identity)."""
    identity = x
    out = conv_bn(x, bp["conv1_w"], bp["bn1_s"], bp["bn1_b"],
                  stride=bp["stride"], pad=1, relu=True)
    if "down_w" in bp:
        identity = conv_bn(x, bp["down_w"], bp["dbn_s"], bp["dbn_b"],
                           stride=bp["stride"], pad=0, relu=False)
    out = conv_bn(out, bp["conv2_w"], bp["bn2_s"], bp["bn2_b"],
                  stride=1, pad=1, relu=True, residual=identity)
    return out


def pretrained_encoder_forward(x_nchw, params, channels=3):
    """Matches PretrainedEncoder.forward -> Encoder.forward (resnet18 path).

    x_nchw: (N, C, H, W) float32.  Returns a list of `blocks` NCHW feature maps.
    """
    # PretrainedEncoder.forward: x.repeat(1, channels, 1, 1) when channel counts differ
    # (exactly torch's semantics: tiles the existing channel dim `channels` times).
    if channels != x_nchw.shape[1]:
        x_nchw = jnp.tile(x_nchw, (1, channels, 1, 1))
    x = jnp.transpose(x_nchw, (0, 2, 3, 1))   # NCHW -> NHWC for the kernels

    # stem: conv1 -> bn1 -> relu -> maxpool
    x = conv_bn(x, params["conv1_w"], params["bn1_s"], params["bn1_b"],
                stride=2, pad=3, relu=True)
    x = max_pool_3x3_s2_p1(x)

    results = []
    res = x
    for layer_blocks in params["layers"]:
        for bp in layer_blocks:
            res = basic_block(res, bp)
        results.append(jnp.transpose(res, (0, 3, 1, 2)))  # back to NCHW, like torch
    return results


# ----------------------------------------------------------------------------
# main
# ----------------------------------------------------------------------------

if __name__ == "__main__":
    key = jax.random.PRNGKey(0)
    k_in, _ = jax.random.split(key)

    # Small, module-consistent shapes: batch=2, 1-channel input repeated to 3, 16x16 spatial.
    x = jax.random.normal(k_in, (2, 1, 16, 16), jnp.float32)
    params = init_resnet18_encoder_params(seed=0, in_ch=3, blocks=4)

    outs = pretrained_encoder_forward(x, params, channels=3)
    outs = [jax.block_until_ready(o) for o in outs]

    expected_channels = [64, 128, 256, 512]  # == self.layer_sizes for resnet18
    assert len(outs) == 4
    for o, c in zip(outs, expected_channels):
        assert o.shape[0] == 2 and o.shape[1] == c, o.shape
        assert bool(jnp.all(jnp.isfinite(o)))

    print("KERNEL_OK")
</pallas_src>

<mosaic_0001>
module attributes {stable_mosaic.version = 11 : i64} {
  func.func @kernel(%arg0: i32, %arg1: i32, %arg2: i32, %arg3: memref<128x256xbf16, #tpu.memory_space<vmem>>, %arg4: memref<256x128xbf16, #tpu.memory_space<vmem>>, %arg5: memref<1x128xf32, #tpu.memory_space<vmem>>, %arg6: memref<1x128xf32, #tpu.memory_space<vmem>>, %arg7: memref<128x128xf32, #tpu.memory_space<vmem>>, %arg8: memref<128x128xf32, #tpu.memory_space<vmem>>) attributes {dimension_semantics = [#tpu.dimension_semantics<parallel>, #tpu.dimension_semantics<parallel>, #tpu.dimension_semantics<arbitrary>], iteration_bounds = array<i64: 1, 1, 1>, scalar_prefetch = 0 : i64, scratch_operands = 1 : i64, tpu.core_type = #tpu.core_type<tc>, window_params = [{transform_indices = @transform_0, window_bounds = array<i64: 128, 256>}, {transform_indices = @transform_1, window_bounds = array<i64: 256, 128>}, {transform_indices = @transform_2, window_bounds = array<i64: 1, 128>}, {transform_indices = @transform_3, window_bounds = array<i64: 1, 128>}, {transform_indices = @transform_4, window_bounds = array<i64: 128, 128>}]} {
    %c0_i32 = arith.constant 0 : i32
    %0 = arith.cmpi eq, %arg2, %c0_i32 : i32
    %1 = arith.extui %0 : i1 to i32
    %c0_i32_0 = arith.constant 0 : i32
    %2 = arith.cmpi ne, %1, %c0_i32_0 : i32
    scf.if %2 {
      %cst_10 = arith.constant 0.000000e+00 : f32
      %12 = vector.broadcast %cst_10 : f32 to vector<128x128xf32>
      %c0_11 = arith.constant 0 : index
      %c0_12 = arith.constant 0 : index
      %13 = vector.load %arg8[%c0_11, %c0_12] : memref<128x128xf32, #tpu.memory_space<vmem>>, vector<128x128xf32>
      tpu.vector_store %arg8[%c0_11, %c0_12], %12 {strides = array<i32>} : memref<128x128xf32, #tpu.memory_space<vmem>>, vector<128x128xf32>,
    } else {
    }
    %c0 = arith.constant 0 : index
    %c0_1 = arith.constant 0 : index
    %3 = vector.load %arg8[%c0, %c0_1] : memref<128x128xf32, #tpu.memory_space<vmem>>, vector<128x128xf32>
    %c0_2 = arith.constant 0 : index
    %c0_3 = arith.constant 0 : index
    %4 = vector.load %arg3[%c0_2, %c0_3] : memref<128x256xbf16, #tpu.memory_space<vmem>>, vector<128x256xbf16>
    %c0_4 = arith.constant 0 : index
    %c0_5 = arith.constant 0 : index
    %5 = vector.load %arg4[%c0_4, %c0_5] : memref<256x128xbf16, #tpu.memory_space<vmem>>, vector<256x128xbf16>
    %cst = arith.constant dense<0.000000e+00> : vector<128x128xf32>
    %6 = tpu.matmul %4, %5, %cst {dimension_numbers = #tpu.dot_dimension_numbers<[1], [0], [0], [1], [0, 0, 1, 1], [], []>} : vector<128x256xbf16>, vector<256x128xbf16>, vector<128x128xf32> -> vector<128x128xf32>
    %7 = arith.addf %3, %6 : vector<128x128xf32>
    %c0_6 = arith.constant 0 : index
    %c0_7 = arith.constant 0 : index
    %8 = vector.load %arg8[%c0_6, %c0_7] : memref<128x128xf32, #tpu.memory_space<vmem>>, vector<128x128xf32>
    tpu.vector_store %arg8[%c0_6, %c0_7], %7 {strides = array<i32>} : memref<128x128xf32, #tpu.memory_space<vmem>>, vector<128x128xf32>,
    %c0_i32_8 = arith.constant 0 : i32
    %9 = arith.cmpi eq, %arg2, %c0_i32_8 : i32
    %10 = arith.extui %9 : i1 to i32
    %c0_i32_9 = arith.constant 0 : i32
    %11 = arith.cmpi ne, %10, %c0_i32_9 : i32
    scf.if %11 {
      %c0_10 = arith.constant 0 : index
      %c0_11 = arith.constant 0 : index
      %12 = vector.load %arg8[%c0_10, %c0_11] : memref<128x128xf32, #tpu.memory_space<vmem>>, vector<128x128xf32>
      %c0_12 = arith.constant 0 : index
      %c0_13 = arith.constant 0 : index
      %13 = vector.load %arg5[%c0_12, %c0_13] : memref<1x128xf32, #tpu.memory_space<vmem>>, vector<1x128xf32>
      %14 = vector.broadcast %13 : vector<1x128xf32> to vector<128x128xf32>
      %15 = arith.mulf %12, %14 : vector<128x128xf32>
      %c0_14 = arith.constant 0 : index
      %c0_15 = arith.constant 0 : index
      %16 = vector.load %arg6[%c0_14, %c0_15] : memref<1x128xf32, #tpu.memory_space<vmem>>, vector<1x128xf32>
      %17 = vector.broadcast %16 : vector<1x128xf32> to vector<128x128xf32>
      %18 = arith.addf %15, %17 : vector<128x128xf32>
      %cst_16 = arith.constant 0.000000e+00 : f32
      %19 = vector.broadcast %cst_16 : f32 to vector<128x128xf32>
      %20 = arith.maximumf %18, %19 : vector<128x128xf32>
      %c0_17 = arith.constant 0 : index
      %c0_18 = arith.constant 0 : index
      %21 = vector.load %arg7[%c0_17, %c0_18] : memref<128x128xf32, #tpu.memory_space<vmem>>, vector<128x128xf32>
      tpu.vector_store %arg7[%c0_17, %c0_18], %20 {strides = array<i32>} : memref<128x128xf32, #tpu.memory_space<vmem>>, vector<128x128xf32>,
    } else {
    }
    return
  }
  func.func @transform_0(%arg0: i32, %arg1: i32, %arg2: i32) -> (i32, i32) {
    %c0_i32 = arith.constant 0 : i32
    return %arg0, %arg2 : i32, i32
  }
  func.func @transform_1(%arg0: i32, %arg1: i32, %arg2: i32) -> (i32, i32) {
    %c0_i32 = arith.constant 0 : i32
    return %arg2, %arg1 : i32, i32
  }
  func.func @transform_2(%arg0: i32, %arg1: i32, %arg2: i32) -> (i32, i32) {
    %c0_i32 = arith.constant 0 : i32
    %c0_i32_0 = arith.constant 0 : i32
    return %c0_i32, %arg1 : i32, i32
  }
  func.func @transform_3(%arg0: i32, %arg1: i32, %arg2: i32) -> (i32, i32) {
    %c0_i32 = arith.constant 0 : i32
    %c0_i32_0 = arith.constant 0 : i32
    return %c0_i32, %arg1 : i32, i32
  }
  func.func @transform_4(%arg0: i32, %arg1: i32, %arg2: i32) -> (i32, i32) {
    %c0_i32 = arith.constant 0 : i32
    return %arg0, %arg1 : i32, i32
  }
}

</mosaic_0001>

<bundles_post_ra>
// kernel: tpu_custom_call.1
= control target key start
LH: loop header
LB: loop body
LE: loop exit
PB: predicated region body
PF: predicated region fallthrough
CT: control target
= control target key end

     0   :  { %9 = vsyncpa [#allocation4], 0  ;;  %s900_s0 = inlined_call_operand.hbm [shape: bf16[128,256], index: 0, kind: input, shape index: {}]   ;;  %s901_s1 = inlined_call_operand.hbm [shape: bf16[256,128], index: 1, kind: input, shape index: {}]   ;;  %s902_s2 = inlined_call_operand.vmem [shape: f32[1,128], index: 2, kind: input, shape index: {}]   ;;  %s903_s3 = inlined_call_operand.vmem [shape: f32[1,128], index: 3, kind: input, shape index: {}]   ;;  %s904_s4 = inlined_call_operand.hbm [shape: f32[128,128], index: 4, kind: output, shape index: {}]  }
   0x1   :  { %10 = vsyncpa [#allocation7], 0 }
   0x2   :  { %11 = vsyncpa [#allocation5], 0  ;;  %s784_s15 = smov [#allocation3]   ;;  %s712_s19 = scalar_lea.hbm %s900_s0, 2048 }
   0x3   :  { %s17_s16 = sshll.u32 %s784_s15, 4  ;;  %p713_p0 = scmp.ne.s32.totalorder %s900_s0, %s712_s19  ;;  %s18_s16 = int_to_ptr.vmem [resolvable:$true] %s17_s16 }
   0x4   :  { %p716_p1 = scmp.lt.u32.totalorder %s712_s19, %s900_s0 }
   0x6   :  { %p718_p2 = pnand %p716_p1, %p713_p0 }
   0x8   :  { %721 = shalt.err (!%p718_p2)
}
   0x9   :  { %s722_s24 = scalar_lea.vmem %s18_s16, 2048  ;;  %p727_p4 = scmp.lt.s32.totalorder %s18_s16, %s18_s16 }
   0xa   :  { %p723_p3 = scmp.ne.s32.totalorder %s18_s16, %s722_s24  ;;  %p728_p5 = scmp.lt.s32.totalorder %s722_s24, %s722_s24 }
   0xc   :  { %p729_p6 = por %p728_p5, %p727_p4 }
   0xe   :  { %p730_p7 = pnand %p729_p6, %p723_p3 }
  0x10   :  { %733 = shalt.err (!%p730_p7)
}
  0x11   :  { %s785_s25 = smov 128   ;;  %s786_s26 = smov 8  }
  0x12   :  { %23 = dma.hbm_to_vmem [thread:$0]  %s900_s0, 2048, %s18_s16, [#allocation4], %s785_s25, %s785_s25, %s786_s26  }
  0x13   :  { %s787_s29 = smov [#allocation6]   ;;  %s734_s7 = scalar_lea.hbm %s901_s1, 2048 }
  0x14   :  { %s29_s30 = sshll.u32 %s787_s29, 4  ;;  %p735_p8 = scmp.ne.s32.totalorder %s901_s1, %s734_s7  ;;  %s30_s30 = int_to_ptr.vmem [resolvable:$true] %s29_s30 }
  0x15   :  { %p738_p9 = scmp.lt.u32.totalorder %s734_s7, %s901_s1 }
  0x17   :  { %p740_p10 = pnand %p738_p9, %p735_p8 }
  0x19   :  { %743 = shalt.err (!%p740_p10)
}
  0x1a   :  { %s744_s12 = scalar_lea.vmem %s30_s30, 2048  ;;  %p749_p12 = scmp.lt.s32.totalorder %s30_s30, %s30_s30 }
  0x1b   :  { %p745_p11 = scmp.ne.s32.totalorder %s30_s30, %s744_s12  ;;  %p750_p13 = scmp.lt.s32.totalorder %s744_s12, %s744_s12 }
  0x1d   :  { %p751_p0 = por %p750_p13, %p749_p12 }
  0x1f   :  { %p752_p1 = pnand %p751_p0, %p745_p11 }
  0x21   :  { %755 = shalt.err (!%p752_p1)
}
  0x22   :  { %s788_s0 = smov 64   ;;  %s789_s13 = smov 4  }
  0x23   :  { %35 = dma.hbm_to_vmem [thread:$0]  %s901_s1, 2048, %s30_s30, [#allocation7], %s788_s0, %s788_s0, %s789_s13  }
  0x24   :  { %778 = dma.done.wait [#allocation4], 2048  }
  0x25   :  { %779 = vsyncadd [#allocation4], 4294965248 }
  0x26   :  { %780 = dma.done.wait [#allocation7], 2048  }
  0x27   :  { %781 = vsyncadd [#allocation7], 4294965248  ;;  %v672_v0 = vld [vmem:[#allocation6 + $0x40] sm:$0xff]   ;;  %v674_v2 = vld [vmem:[#allocation6 + $0x48] sm:$0xff]  }
  0x28   :  { %v673_v1 = vld [vmem:[#allocation6] sm:$0xff]   ;;  %585 = vmatprep.subr.bf16.mxu0 %v672_v0  ;;  %649 = vmatprep.subr.bf16.mxu1 %v672_v0  ;;  %v675_v3 = vld [vmem:[#allocation6 + $0x8] sm:$0xff]   ;;  %v676_v4 = vld [vmem:[#allocation6 + $0x50] sm:$0xff]  }
  0x29   :  { %586 = vmatpush3.bf16.msra.mxu0 %v673_v1  ;;  %657 = vmatpush3.bf16.msra.mxu1 %v673_v1  ;;  %v677_v5 = vld [vmem:[#allocation6 + $0x10] sm:$0xff]   ;;  %v678_v6 = vld [vmem:[#allocation6 + $0x58] sm:$0xff]   ;;  %v680_v8 = vld [vmem:[#allocation6 + $0x60] sm:$0xff]  }
  0x2a   :  { %587 = vmatprep.subr.bf16.mxu0 %v674_v2  ;;  %650 = vmatprep.subr.bf16.mxu1 %v674_v2  ;;  %v679_v7 = vld [vmem:[#allocation6 + $0x18] sm:$0xff]   ;;  %v681_v9 = vld [vmem:[#allocation6 + $0x20] sm:$0xff]   ;;  %v682_v10 = vld [vmem:[#allocation6 + $0x68] sm:$0xff]  }
  0x2b   :  { %v690_v11 = vld [vmem:[#allocation3 + $0x4] ss:$8 sps:$4 sm:$0xff]   ;;  %v684_v14 = vld [vmem:[#allocation6 + $0x70] sm:$0xff]   ;;  %v686_v16 = vld [vmem:[#allocation6 + $0x78] sm:$0xff]  }
  0x2c   :  { %v693_v12 = vld [vmem:[#allocation3 + $0x44] ss:$8 sps:$4 sm:$0xff]   ;;  %339 = vmatprep.mubr.bf16.mxu0 %v690_v11  ;;  %v685_v15 = vld [vmem:[#allocation6 + $0x30] sm:$0xff]   ;;  %v687_v17 = vld [vmem:[#allocation6 + $0x38] sm:$0xff]  }
  0x2d   :  { %588 = vmatpush3.bf16.msra.mxu0 %v675_v3  ;;  %658 = vmatpush3.bf16.msra.mxu1 %v675_v3  ;;  %v683_v13 = vld [vmem:[#allocation6 + $0x28] sm:$0xff]   ;;  %v694_v20 = vld [vmem:[#allocation3 + $0x14] ss:$8 sps:$4 sm:$0xff]   ;;  %v698_v22 = vld [vmem:[#allocation3 + $0x10] ss:$8 sps:$4 sm:$0xff]  }
  0x2e   :  { %589 = vmatprep.subr.bf16.mxu0 %v676_v4  ;;  %651 = vmatprep.subr.bf16.mxu1 %v676_v4  ;;  %v688_v18 = vld [vmem:[#allocation3] ss:$8 sps:$4 sm:$0xff]   ;;  %v696_v21 = vld [vmem:[#allocation3 + $0x54] ss:$8 sps:$4 sm:$0xff]   ;;  %v699_v23 = vld [vmem:[#allocation3 + $0x50] ss:$8 sps:$4 sm:$0xff]  }
  0x2f   :  { %371 = vmatprep.mubr.bf16.mxu1 %v693_v12  ;;  %v691_v19 = vld [vmem:[#allocation3 + $0x40] ss:$8 sps:$4 sm:$0xff]   ;;  %v700_v24 = vld [vmem:[#allocation3 + $0x24] ss:$8 sps:$4 sm:$0xff]   ;;  %v706_v28 = vld [vmem:[#allocation3 + $0x34] ss:$8 sps:$4 sm:$0xff]  }
  0x30   :  { %v702_v25 = vld [vmem:[#allocation3 + $0x64] ss:$8 sps:$4 sm:$0xff]   ;;  %v704_v26 = vld [vmem:[#allocation3 + $0x20] ss:$8 sps:$4 sm:$0xff]   ;;  %v708_v29 = vld [vmem:[#allocation3 + $0x74] ss:$8 sps:$4 sm:$0xff]  }
  0x31   :  { %590 = vmatpush3.bf16.msra.mxu0 %v677_v5  ;;  %659 = vmatpush3.bf16.msra.mxu1 %v677_v5  ;;  %v705_v27 = vld [vmem:[#allocation3 + $0x60] ss:$8 sps:$4 sm:$0xff]   ;;  %v710_v30 = vld [vmem:[#allocation3 + $0x30] ss:$8 sps:$4 sm:$0xff]  }
  0x32   :  { %591 = vmatprep.subr.bf16.mxu0 %v678_v6  ;;  %652 = vmatprep.subr.bf16.mxu1 %v678_v6  ;;  %v711_v31 = vld [vmem:[#allocation3 + $0x70] ss:$8 sps:$4 sm:$0xff]   ;;  %v846_v35 = vld [vmem:[%s902_s2] ss:$0 sm:$0xff]  ;;  %s790_s2 = smov [#allocation8]  }
  0x33   :  { %v851_v41 = vld [vmem:[%s903_s3] ss:$0 sm:$0xff]  ;;  %s538_s3 = sshll.u32 %s790_s2, 4  ;;  %s539_s3 = int_to_ptr.vmem [resolvable:$true] %s538_s3 }
  0x34   :  { %s756_s19 = scalar_lea.vmem %s539_s3, 2048  ;;  %p761_p3 = scmp.lt.s32.totalorder %s539_s3, %s539_s3 }
  0x35   :  { %592 = vmatpush3.bf16.msra.mxu0 %v679_v7  ;;  %660 = vmatpush3.bf16.msra.mxu1 %v679_v7  ;;  %p757_p2 = scmp.ne.s32.totalorder %s539_s3, %s756_s19  ;;  %p762_p4 = scmp.lt.s32.totalorder %s756_s19, %s756_s19 }
  0x36   :  { %593 = vmatprep.subr.bf16.mxu0 %v680_v8  ;;  %653 = vmatprep.subr.bf16.mxu1 %v680_v8 }
  0x37   :  { %p763_p5 = por %p762_p4, %p761_p3 }
  0x39   :  { %594 = vmatpush3.bf16.msra.mxu0 %v681_v9  ;;  %661 = vmatpush3.bf16.msra.mxu1 %v681_v9  ;;  %p764_p6 = pnand %p763_p5, %p757_p2 }
  0x3a   :  { %595 = vmatprep.subr.bf16.mxu0 %v682_v10  ;;  %654 = vmatprep.subr.bf16.mxu1 %v682_v10 }
  0x3d   :  { %596 = vmatpush3.bf16.msra.mxu0 %v683_v13  ;;  %662 = vmatpush3.bf16.msra.mxu1 %v683_v13 }
  0x3e   :  { %597 = vmatprep.subr.bf16.mxu0 %v684_v14  ;;  %655 = vmatprep.subr.bf16.mxu1 %v684_v14 }
  0x41   :  { %598 = vmatpush3.bf16.msra.mxu0 %v685_v15  ;;  %663 = vmatpush3.bf16.msra.mxu1 %v685_v15 }
  0x42   :  { %599 = vmatprep.subr.bf16.mxu0 %v686_v16  ;;  %656 = vmatprep.subr.bf16.mxu1 %v686_v16 }
  0x45   :  { %600 = vmatpush3.bf16.msra.mxu0 %v687_v17  ;;  %664 = vmatpush3.bf16.msra.mxu1 %v687_v17 }
  0x48   :  { %340 = vmatmul.mubr.bf16.vlgmr.msra.gmra.mrb[0].mxu0 %v688_v18  ;;  %372 = vmatmul.mubr.bf16.vlgmr.msra.gmra.mrb[0].mxu1 %v691_v19 }
  0x49   :  { %347 = vmatprep.mubr.bf16.mxu0 %v694_v20  ;;  %379 = vmatprep.mubr.bf16.mxu1 %v696_v21 }
  0x50   :  { %348 = vmatmul.mubr.bf16.gmra.mrb[4].mxu0 %v698_v22  ;;  %380 = vmatmul.mubr.bf16.gmra.mrb[4].mxu1 %v699_v23 }
  0x51   :  { %355 = vmatprep.mubr.bf16.mxu0 %v700_v24  ;;  %387 = vmatprep.mubr.bf16.mxu1 %v702_v25 }
  0x58   :  { %356 = vmatmul.mubr.bf16.gmra.mrb[8].mxu0 %v704_v26  ;;  %388 = vmatmul.mubr.bf16.gmra.mrb[8].mxu1 %v705_v27 }
  0x59   :  { %363 = vmatprep.mubr.bf16.mxu0 %v706_v28  ;;  %395 = vmatprep.mubr.bf16.mxu1 %v708_v29 }
  0x60   :  { %364 = vmatmul.mubr.bf16.gmra.mrb[12].mxu0 %v710_v30  ;;  %396 = vmatmul.mubr.bf16.gmra.mrb[12].mxu1 %v711_v31 }
 0x11b   :  { %v601_v32 = vpop.f32.mrb[0].mxu0  ;;  %v625_v33 = vpop.f32.mrb[0].mxu1 }
 0x11c   :  { %v602_v34 = vpop.f32.mrb[1].mxu0  ;;  %v626_v36 = vpop.f32.mrb[1].mxu1 }
 0x11d   :  { %v603_v37 = vadd.f32 %v602_v34, %v601_v32  ;;  %v627_v38 = vadd.f32 %v626_v36, %v625_v33  ;;  %v604_v39 = vpop.f32.mrb[2].mxu0  ;;  %v628_v40 = vpop.f32.mrb[2].mxu1 }
 0x11e   :  { %v605_v42 = vpop.f32.mrb[3].mxu0  ;;  %v629_v43 = vpop.f32.mrb[3].mxu1 }
 0x11f   :  { %v462_v44 = vmul.f32 %v603_v37, %v846_v35  ;;  %v470_v45 = vmul.f32 %v627_v38, %v846_v35  ;;  %v606_v46 = vadd.f32 %v605_v42, %v604_v39  ;;  %v630_v47 = vadd.f32 %v629_v43, %v628_v40 }
 0x121   :  { %v485_v48 = vadd.f32 %v851_v41, %v462_v44  ;;  %v493_v49 = vadd.f32 %v851_v41, %v470_v45  ;;  %v463_v50 = vmul.f32 %v606_v46, %v846_v35  ;;  %v471_v51 = vmul.f32 %v630_v47, %v846_v35 }
 0x123   :  { %v501_v52 = vmax.f32 %v485_v48, 0.0  ;;  %v509_v53 = vmax.f32 %v493_v49, 0.0  ;;  %v486_v54 = vadd.f32 %v851_v41, %v463_v50  ;;  %v494_v55 = vadd.f32 %v851_v41, %v471_v51  ;;  %v607_v56 = vpop.f32.mrb[4].mxu0  ;;  %v631_v57 = vpop.f32.mrb[4].mxu1 }
 0x124   :  { %v608_v58 = vpop.f32.mrb[5].mxu0  ;;  %v632_v59 = vpop.f32.mrb[5].mxu1 }
 0x125   :  { %517 = vst [vmem:[#allocation8] sm:$0xff] %v501_v52  ;;  %525 = vst [vmem:[#allocation8 + $0x40] sm:$0xff] %v509_v53  ;;  %v502_v60 = vmax.f32 %v486_v54, 0.0  ;;  %v510_v61 = vmax.f32 %v494_v55, 0.0  ;;  %v609_v62 = vadd.f32 %v608_v58, %v607_v56  ;;  %v633_v63 = vadd.f32 %v632_v59, %v631_v57  ;;  %v610_v0 = vpop.f32.mrb[6].mxu0  ;;  %v634_v1 = vpop.f32.mrb[6].mxu1 }
 0x126   :  { %v611_v2 = vpop.f32.mrb[7].mxu0  ;;  %v635_v3 = vpop.f32.mrb[7].mxu1 }
 0x127   :  { %518 = vst [vmem:[#allocation8 + $0x8] sm:$0xff] %v502_v60  ;;  %526 = vst [vmem:[#allocation8 + $0x48] sm:$0xff] %v510_v61  ;;  %v464_v4 = vmul.f32 %v609_v62, %v846_v35  ;;  %v472_v5 = vmul.f32 %v633_v63, %v846_v35  ;;  %v612_v6 = vadd.f32 %v611_v2, %v610_v0 }
 0x128   :  { %v636_v7 = vadd.f32 %v635_v3, %v634_v1 }
 0x129   :  { %v487_v8 = vadd.f32 %v851_v41, %v464_v4  ;;  %v495_v9 = vadd.f32 %v851_v41, %v472_v5  ;;  %v465_v10 = vmul.f32 %v612_v6, %v846_v35 }
 0x12a   :  { %v473_v11 = vmul.f32 %v636_v7, %v846_v35 }
 0x12b   :  { %v503_v12 = vmax.f32 %v487_v8, 0.0  ;;  %v511_v13 = vmax.f32 %v495_v9, 0.0  ;;  %v488_v14 = vadd.f32 %v851_v41, %v465_v10  ;;  %v613_v16 = vpop.f32.mrb[8].mxu0  ;;  %v637_v17 = vpop.f32.mrb[8].mxu1 }
 0x12c   :  { %v496_v15 = vadd.f32 %v851_v41, %v473_v11  ;;  %v614_v18 = vpop.f32.mrb[9].mxu0  ;;  %v638_v19 = vpop.f32.mrb[9].mxu1 }
 0x12d   :  { %519 = vst [vmem:[#allocation8 + $0x10] sm:$0xff] %v503_v12  ;;  %527 = vst [vmem:[#allocation8 + $0x50] sm:$0xff] %v511_v13  ;;  %v504_v20 = vmax.f32 %v488_v14, 0.0  ;;  %v615_v22 = vadd.f32 %v614_v18, %v613_v16  ;;  %v639_v23 = vadd.f32 %v638_v19, %v637_v17  ;;  %v616_v24 = vpop.f32.mrb[10].mxu0  ;;  %v640_v25 = vpop.f32.mrb[10].mxu1 }
 0x12e   :  { %v512_v21 = vmax.f32 %v496_v15, 0.0  ;;  %v617_v26 = vpop.f32.mrb[11].mxu0  ;;  %v641_v27 = vpop.f32.mrb[11].mxu1 }
 0x12f   :  { %520 = vst [vmem:[#allocation8 + $0x18] sm:$0xff] %v504_v20  ;;  %v466_v28 = vmul.f32 %v615_v22, %v846_v35  ;;  %v474_v29 = vmul.f32 %v639_v23, %v846_v35  ;;  %v618_v30 = vadd.f32 %v617_v26, %v616_v24  ;;  %v642_v31 = vadd.f32 %v641_v27, %v640_v25 }
 0x130   :  { %528 = vst [vmem:[#allocation8 + $0x58] sm:$0xff] %v512_v21 }
 0x131   :  { %v489_v32 = vadd.f32 %v851_v41, %v466_v28  ;;  %v497_v33 = vadd.f32 %v851_v41, %v474_v29  ;;  %v467_v34 = vmul.f32 %v618_v30, %v846_v35  ;;  %v475_v36 = vmul.f32 %v642_v31, %v846_v35 }
 0x133   :  { %v505_v37 = vmax.f32 %v489_v32, 0.0  ;;  %v513_v38 = vmax.f32 %v497_v33, 0.0  ;;  %v490_v39 = vadd.f32 %v851_v41, %v467_v34  ;;  %v498_v40 = vadd.f32 %v851_v41, %v475_v36  ;;  %v619_v42 = vpop.f32.mrb[12].mxu0  ;;  %v643_v43 = vpop.f32.mrb[12].mxu1 }
 0x134   :  { %v620_v44 = vpop.f32.mrb[13].mxu0  ;;  %v644_v45 = vpop.f32.mrb[13].mxu1 }
 0x135   :  { %521 = vst [vmem:[#allocation8 + $0x20] sm:$0xff] %v505_v37  ;;  %529 = vst [vmem:[#allocation8 + $0x60] sm:$0xff] %v513_v38  ;;  %v506_v46 = vmax.f32 %v490_v39, 0.0  ;;  %v514_v47 = vmax.f32 %v498_v40, 0.0  ;;  %v621_v48 = vadd.f32 %v620_v44, %v619_v42  ;;  %v645_v49 = vadd.f32 %v644_v45, %v643_v43  ;;  %v622_v50 = vpop.f32.mrb[14].mxu0  ;;  %v646_v51 = vpop.f32.mrb[14].mxu1 }
 0x136   :  { %v623_v52 = vpop.f32.mrb[15].mxu0  ;;  %v647_v53 = vpop.f32.mrb[15].mxu1 }
 0x137   :  { %522 = vst [vmem:[#allocation8 + $0x28] sm:$0xff] %v506_v46  ;;  %530 = vst [vmem:[#allocation8 + $0x68] sm:$0xff] %v514_v47  ;;  %v468_v54 = vmul.f32 %v621_v48, %v846_v35  ;;  %v476_v55 = vmul.f32 %v645_v49, %v846_v35  ;;  %v624_v56 = vadd.f32 %v623_v52, %v622_v50 }
 0x138   :  { %v648_v57 = vadd.f32 %v647_v53, %v646_v51 }
 0x139   :  { %v491_v58 = vadd.f32 %v851_v41, %v468_v54  ;;  %v499_v59 = vadd.f32 %v851_v41, %v476_v55  ;;  %v469_v60 = vmul.f32 %v624_v56, %v846_v35 }
 0x13a   :  { %v477_v61 = vmul.f32 %v648_v57, %v846_v35 }
 0x13b   :  { %v507_v62 = vmax.f32 %v491_v58, 0.0  ;;  %v515_v63 = vmax.f32 %v499_v59, 0.0  ;;  %v492_v0 = vadd.f32 %v851_v41, %v469_v60 }
 0x13c   :  { %v500_v1 = vadd.f32 %v851_v41, %v477_v61 }
 0x13d   :  { %523 = vst [vmem:[#allocation8 + $0x30] sm:$0xff] %v507_v62  ;;  %531 = vst [vmem:[#allocation8 + $0x70] sm:$0xff] %v515_v63  ;;  %v508_v2 = vmax.f32 %v492_v0, 0.0 }
 0x13e   :  { %v516_v3 = vmax.f32 %v500_v1, 0.0 }
 0x13f   :  { %524 = vst [vmem:[#allocation8 + $0x38] sm:$0xff] %v508_v2 }
 0x140   :  { %532 = vst [vmem:[#allocation8 + $0x78] sm:$0xff] %v516_v3 }
 0x141   :  { %767 = shalt.err (!%p764_p6)
}
 0x142   :  { %s768_s22 = scalar_lea.hbm %s904_s4, 2048 }
 0x143   :  { %p769_p7 = scmp.ne.s32.totalorder %s904_s4, %s768_s22  ;;  %p772_p8 = scmp.lt.u32.totalorder %s768_s22, %s904_s4 }
 0x145   :  { %p774_p9 = pnand %p772_p8, %p769_p7 }
 0x147   :  { %777 = shalt.err (!%p774_p9)
}
 0x148   :  { %544 = dma.vmem_to_hbm [thread:$0]  %s539_s3, 2048, %s904_s4, [#allocation5], %s785_s25, %s785_s25, %s786_s26  }
 0x149   :  { %782 = dma.done.wait [#allocation5], 2048  }
 0x14a   :  { %783 = vsyncadd [#allocation5], 4294965248 }
 0x14b   :  { %548 = vsyncpa [#allocation4], 1 }
 0x14c   :  { %549 = vsyncpa [#allocation7], 1 }
 0x14d   :  { %550 = vsyncpa [#allocation5], 1 }

</bundles_post_ra>
